<compile_context>
chip_gen: v7x
topology: tpu7x:2x2x1
jax: 0.10.0
libtpu: 0.0.40
codegen_flags: <defaults>
</compile_context>

<pallas_src>
import jax
import jax.numpy as jnp
from jax.experimental import pallas as pl
from jax.experimental.pallas import tpu as pltpu

EPS = 1e-5
_SUB = 8  # sublane group size; slab sections are aligned to it


def _round_up(x, m):
    return (x + m - 1) // m * m


def _leaky_relu(x, slope=0.2):
    return jnp.where(x >= 0, x, slope * x)


# ----------------------------------------------------------------------------
# Parameter slab: one (rows, hidden) f32 array holding every parameter.
# ----------------------------------------------------------------------------
def _pack_param_slab(params, nc, hidden, oc):
    """Layout (all section starts 8-row aligned):
         [sec_w1 : sec_w1+nc]      w1      (nc, hidden)
         [sec_w2 : sec_w2+hidden]  w2      (hidden, hidden)
         [sec_w3 : sec_w3+oc]      w3^T    (oc, hidden)
         [sec_v+0 .. sec_v+3]      gamma1, beta1, gamma2, beta2
         [sec_v+4, :oc]            b3
       b1/b2 are intentionally omitted: pre-BatchNorm(training) Linear biases
       are an exact no-op (removed by the mean subtraction, no effect on the
       biased variance).
       NOTE: only valid for training-mode BN; eval-mode (running stats) would
       need the biases and the running mean/var instead.
    """
    (w1, _b1, g1, be1, w2, _b2, g2, be2, w3, b3) = params
    assert oc <= hidden, "slab packing assumes oc <= hidden"
    sec_w1 = 0
    sec_w2 = _round_up(nc, _SUB)
    sec_w3 = sec_w2 + _round_up(hidden, _SUB)
    sec_v = sec_w3 + _round_up(oc, _SUB)
    rows = _round_up(sec_v + 5, _SUB)

    slab = jnp.zeros((rows, hidden), jnp.float32)
    slab = slab.at[sec_w1:sec_w1 + nc, :].set(w1.astype(jnp.float32))
    slab = slab.at[sec_w2:sec_w2 + hidden, :].set(w2.astype(jnp.float32))
    slab = slab.at[sec_w3:sec_w3 + oc, :].set(w3.T.astype(jnp.float32))
    slab = slab.at[sec_v + 0, :].set(g1.reshape(-1).astype(jnp.float32))
    slab = slab.at[sec_v + 1, :].set(be1.reshape(-1).astype(jnp.float32))
    slab = slab.at[sec_v + 2, :].set(g2.reshape(-1).astype(jnp.float32))
    slab = slab.at[sec_v + 3, :].set(be2.reshape(-1).astype(jnp.float32))
    slab = slab.at[sec_v + 4, :oc].set(b3.reshape(-1).astype(jnp.float32))
    return slab, (sec_w1, sec_w2, sec_w3, sec_v)


# ----------------------------------------------------------------------------
# In-kernel building blocks
# ----------------------------------------------------------------------------
def _bn_train_fused(h, gamma, beta):
    """Training-mode BatchNorm1d over the full batch (axis 0).

    sum and sum-of-squares fused into ONE XLU sublane reduction of
    concat([h, h*h], -1); var = E[h^2] - E[h]^2 (biased, eps=1e-5)."""
    n, hdim = h.shape
    inv_n = 1.0 / n
    s = jnp.sum(jnp.concatenate([h, h * h], axis=1), axis=0, keepdims=True)
    mu = s[:, :hdim] * inv_n
    var = s[:, hdim:] * inv_n - mu * mu
    return (h - mu) * jax.lax.rsqrt(var + EPS) * gamma + beta


def _head_sigmoid(h, w3t, b3, oc):
    """Final Linear(hidden, oc) + Sigmoid.

    oc is tiny (1 here), so instead of a 1-column MXU matmul we do a VPU
    multiply + lane reduction per output column, then the exact tanh-based
    sigmoid (single EUP op)."""
    cols = [jnp.sum(h * w3t[j:j + 1, :], axis=1, keepdims=True)
            for j in range(oc)]
    logits = (cols[0] if oc == 1 else jnp.concatenate(cols, axis=1)) + b3
    return 0.5 * jnp.tanh(0.5 * logits) + 0.5


# ----------------------------------------------------------------------------
# Single-problem kernel (module-equivalent: x is (N, nc), one call, no grid)
# ----------------------------------------------------------------------------
def _make_single_kernel(nc, hidden, oc, sec_w1, sec_w2, sec_w3, sec_v):
    def kernel(x_ref, p_ref, o_ref):
        x = x_ref[...].astype(jnp.float32)                   # (N, nc)

        w1 = p_ref[sec_w1:sec_w1 + nc, :]                    # (nc, H)
        w2 = p_ref[sec_w2:sec_w2 + hidden, :]                # (H, H)
        w3t = p_ref[sec_w3:sec_w3 + oc, :]                   # (oc, H)
        g1 = p_ref[sec_v + 0:sec_v + 1, :]
        be1 = p_ref[sec_v + 1:sec_v + 2, :]
        g2 = p_ref[sec_v + 2:sec_v + 3, :]
        be2 = p_ref[sec_v + 3:sec_v + 4, :]
        b3 = p_ref[sec_v + 4:sec_v + 5, :oc]                 # (1, oc)

        h = jnp.dot(x, w1, preferred_element_type=jnp.float32)
        h = _leaky_relu(_bn_train_fused(h, g1, be1))
        h = jnp.dot(h, w2, preferred_element_type=jnp.float32)
        h = _leaky_relu(_bn_train_fused(h, g2, be2))
        o_ref[...] = _head_sigmoid(h, w3t, b3, oc).astype(o_ref.dtype)

    return kernel


def discriminator_spiral_mine(x, params):
    """Module-equivalent forward: x (N, nc) -> (N, oc).  One grid-less
    pallas_call with exactly 2 inputs (x + packed parameter slab)."""
    n, nc = x.shape
    hidden = params[0].shape[1]
    oc = params[8].shape[1]

    slab, secs = _pack_param_slab(params, nc, hidden, oc)
    kernel = _make_single_kernel(nc, hidden, oc, *secs)

    vmem = pl.BlockSpec(memory_space=pltpu.MemorySpace.VMEM)
    return pl.pallas_call(
        kernel,
        out_shape=jax.ShapeDtypeStruct((n, oc), jnp.float32),
        in_specs=[vmem, vmem],
        out_specs=vmem,
    )(x, slab)


# ----------------------------------------------------------------------------
# Batched kernel: B independent (N, nc) problems in one gridded call.
# This is the structural win: fills MXU rows (block M = problems_per_block*N)
# and the batch grid axis is "parallel" so v7x uses both TensorCores.
# Per-problem BatchNorm is kept exact via a group-indicator matmul (no
# in-kernel reshapes needed).
# ----------------------------------------------------------------------------
def _make_batched_kernel(n, nc, hidden, oc, bb,
                         sec_w1, sec_w2, sec_w3, sec_v,
                         matmul_dtype=jnp.float32):
    m = bb * n            # rows per grid step
    inv_n = 1.0 / n

    def kernel(x_ref, p_ref, o_ref):
        x = x_ref[...].astype(jnp.float32)                   # (m, nc)

        w1 = p_ref[sec_w1:sec_w1 + nc, :].astype(matmul_dtype)
        w2 = p_ref[sec_w2:sec_w2 + hidden, :].astype(matmul_dtype)
        w3t = p_ref[sec_w3:sec_w3 + oc, :]                   # f32 (VPU head)
        g1 = p_ref[sec_v + 0:sec_v + 1, :]
        be1 = p_ref[sec_v + 1:sec_v + 2, :]
        g2 = p_ref[sec_v + 2:sec_v + 3, :]
        be2 = p_ref[sec_v + 3:sec_v + 4, :]
        b3 = p_ref[sec_v + 4:sec_v + 5, :oc]

        # Group-indicator matrices (built from iotas, hoisted once):
        #   G  (bb, m): G[g, r]  = 1 iff row r belongs to problem g
        #   Gt (m, bb): Gt[r, g] = 1 iff row r belongs to problem g
        G = (jax.lax.broadcasted_iota(jnp.int32, (bb, m), 1) // n ==
             jax.lax.broadcasted_iota(jnp.int32, (bb, m), 0)
             ).astype(jnp.float32)
        Gt = (jax.lax.broadcasted_iota(jnp.int32, (m, bb), 0) // n ==
              jax.lax.broadcasted_iota(jnp.int32, (m, bb), 1)
              ).astype(jnp.float32)

        def bn_grouped(h, gamma, beta):
            # Per-problem (group of n rows) training-mode BatchNorm.
            # sum and sum-of-squares fused into one (bb, m) @ (m, 2H) matmul;
            # Gt @ stats broadcasts each group's stats back to its rows.
            hh = jnp.concatenate([h, h * h], axis=1)                      # (m, 2H)
            stats = jnp.dot(G, hh, preferred_element_type=jnp.float32)    # (bb, 2H)
            full = jnp.dot(Gt, stats, preferred_element_type=jnp.float32)  # (m, 2H)
            mu = full[:, :hidden] * inv_n
            var = full[:, hidden:] * inv_n - mu * mu
            return (h - mu) * jax.lax.rsqrt(var + EPS) * gamma + beta

        h = jnp.dot(x.astype(matmul_dtype), w1,
                    preferred_element_type=jnp.float32)
        h = _leaky_relu(bn_grouped(h, g1, be1))
        h = jnp.dot(h.astype(matmul_dtype), w2,
                    preferred_element_type=jnp.float32)
        h = _leaky_relu(bn_grouped(h, g2, be2))
        o_ref[...] = _head_sigmoid(h, w3t, b3, oc).astype(o_ref.dtype)

    return kernel


def discriminator_spiral_mine_batched(xb, params, problems_per_block=16,
                                      matmul_dtype=jnp.float32):
    """xb: (B, N, nc) — B independent discriminator problems, each with its
    own batch statistics over its N rows.  Returns (B, N, oc).

    For large B on v6e/v7x pass matmul_dtype=jnp.bfloat16 (operands only;
    accumulation/BN/sigmoid stay f32).  Do NOT use int8 on v7x (fp8-only MXU).
    """
    B, n, nc = xb.shape
    hidden = params[0].shape[1]
    oc = params[8].shape[1]
    bb = min(problems_per_block, B)
    assert B % bb == 0, "B must be a multiple of problems_per_block"
    m_blk = bb * n

    slab, secs = _pack_param_slab(params, nc, hidden, oc)
    kernel = _make_batched_kernel(n, nc, hidden, oc, bb, *secs,
                                  matmul_dtype=matmul_dtype)

    x2 = xb.reshape(B * n, nc)
    # TODO(synk): for very large deployments, also pack oc outputs of many
    # problems lane-dense (multiple of 128 in the last dim) to avoid the
    # masked 1-lane store; negligible at these sizes.
    out = pl.pallas_call(
        kernel,
        out_shape=jax.ShapeDtypeStruct((B * n, oc), jnp.float32),
        grid_spec=pltpu.PrefetchScalarGridSpec(
            num_scalar_prefetch=0,
            grid=(B // bb,),
            in_specs=[
                pl.BlockSpec((m_blk, nc), lambda i: (i, 0)),
                pl.BlockSpec(slab.shape, lambda i: (0, 0)),  # resident params
            ],
            out_specs=pl.BlockSpec((m_blk, oc), lambda i: (i, 0)),
        ),
        compiler_params=pltpu.CompilerParams(
            dimension_semantics=("parallel",)),  # v7x: shard over both TCs
    )(x2, slab)
    return out.reshape(B, n, oc)


# ----------------------------------------------------------------------------
# Parameter init + pure-JAX reference (original PyTorch structure)
# ----------------------------------------------------------------------------
def init_params(key, nc, hidden, oc):
    ks = jax.random.split(key, 6)

    def linear(kw, kb, fan_in, fan_out):
        bound = 1.0 / jnp.sqrt(fan_in)
        w = jax.random.uniform(kw, (fan_in, fan_out), jnp.float32, -bound, bound)
        b = jax.random.uniform(kb, (1, fan_out), jnp.float32, -bound, bound)
        return w, b

    w1, b1 = linear(ks[0], ks[1], nc, hidden)
    w2, b2 = linear(ks[2], ks[3], hidden, hidden)
    w3, b3 = linear(ks[4], ks[5], hidden, oc)
    g1 = jnp.ones((1, hidden), jnp.float32)
    be1 = jnp.zeros((1, hidden), jnp.float32)
    g2 = jnp.ones((1, hidden), jnp.float32)
    be2 = jnp.zeros((1, hidden), jnp.float32)
    return (w1, b1, g1, be1, w2, b2, g2, be2, w3, b3)


def reference_forward(x, params):
    """Pure-JAX reference with the original structure (biases kept, classic
    mean/var BatchNorm, exact exp-based sigmoid)."""
    (w1, b1, g1, be1, w2, b2, g2, be2, w3, b3) = params

    def bn(h, gamma, beta):
        mu = jnp.mean(h, axis=0, keepdims=True)
        var = jnp.mean((h - mu) * (h - mu), axis=0, keepdims=True)
        return (h - mu) * jax.lax.rsqrt(var + EPS) * gamma + beta

    h = x @ w1 + b1
    h = _leaky_relu(bn(h, g1, be1))
    h = h @ w2 + b2
    h = _leaky_relu(bn(h, g2, be2))
    return 1.0 / (1.0 + jnp.exp(-(h @ w3 + b3)))


if __name__ == "__main__":
    N, NC, HIDDEN, OC = 8, 4, 32, 1

    key = jax.random.PRNGKey(0)
    kx, kp, kb = jax.random.split(key, 3)
    x = jax.random.normal(kx, (N, NC), jnp.float32)
    params = init_params(kp, NC, HIDDEN, OC)

    # --- single-problem (module-equivalent) path ---------------------------
    out = jax.block_until_ready(discriminator_spiral_mine(x, params))
    ref = reference_forward(x, params)
    assert out.shape == (N, OC)
    assert jnp.allclose(out, ref, atol=1e-4, rtol=1e-4), "single-problem mismatch"

    # --- batched path: B independent problems in one gridded call ----------
    B = 16
    xb = jax.random.normal(kb, (B, N, NC), jnp.float32)
    outb = jax.block_until_ready(
        discriminator_spiral_mine_batched(xb, params, problems_per_block=8))
    refb = jax.vmap(lambda xi: reference_forward(xi, params))(xb)
    assert outb.shape == (B, N, OC)
    assert jnp.allclose(outb, refb, atol=1e-4, rtol=1e-4), "batched mismatch"

    print("KERNEL_OK")
</pallas_src>

<mosaic_0001>
module attributes {stable_mosaic.version = 11 : i64} {
  func.func @kernel(%arg0: memref<8x4xf32, #tpu.memory_space<vmem>>, %arg1: memref<56x32xf32, #tpu.memory_space<vmem>>, %arg2: memref<8x1xf32, #tpu.memory_space<vmem>>) attributes {dimension_semantics = [], scalar_prefetch = 0 : i64, scratch_operands = 0 : i64, tpu.core_type = #tpu.core_type<tc>} {
    %c0 = arith.constant 0 : index
    %c0_0 = arith.constant 0 : index
    %0 = vector.load %arg0[%c0, %c0_0] : memref<8x4xf32, #tpu.memory_space<vmem>>, vector<8x4xf32>
    %c0_1 = arith.constant 0 : index
    %c0_2 = arith.constant 0 : index
    %1 = vector.load %arg1[%c0_1, %c0_2] : memref<56x32xf32, #tpu.memory_space<vmem>>, vector<4x32xf32>
    %c8 = arith.constant 8 : index
    %c0_3 = arith.constant 0 : index
    %2 = vector.load %arg1[%c8, %c0_3] : memref<56x32xf32, #tpu.memory_space<vmem>>, vector<32x32xf32>
    %c40 = arith.constant 40 : index
    %c0_4 = arith.constant 0 : index
    %3 = vector.load %arg1[%c40, %c0_4] : memref<56x32xf32, #tpu.memory_space<vmem>>, vector<1x32xf32>
    %c48 = arith.constant 48 : index
    %c0_5 = arith.constant 0 : index
    %4 = vector.load %arg1[%c48, %c0_5] : memref<56x32xf32, #tpu.memory_space<vmem>>, vector<1x32xf32>
    %c49 = arith.constant 49 : index
    %c0_6 = arith.constant 0 : index
    %5 = vector.load %arg1[%c49, %c0_6] : memref<56x32xf32, #tpu.memory_space<vmem>>, vector<1x32xf32>
    %c50 = arith.constant 50 : index
    %c0_7 = arith.constant 0 : index
    %6 = vector.load %arg1[%c50, %c0_7] : memref<56x32xf32, #tpu.memory_space<vmem>>, vector<1x32xf32>
    %c51 = arith.constant 51 : index
    %c0_8 = arith.constant 0 : index
    %7 = vector.load %arg1[%c51, %c0_8] : memref<56x32xf32, #tpu.memory_space<vmem>>, vector<1x32xf32>
    %c52 = arith.constant 52 : index
    %c0_9 = arith.constant 0 : index
    %8 = vector.load %arg1[%c52, %c0_9] : memref<56x32xf32, #tpu.memory_space<vmem>>, vector<1x1xf32>
    %cst = arith.constant dense<0.000000e+00> : vector<8x32xf32>
    %9 = tpu.matmul %0, %1, %cst {dimension_numbers = #tpu.dot_dimension_numbers<[1], [0], [0], [1], [0, 0, 1, 1], [], []>} : vector<8x4xf32>, vector<4x32xf32>, vector<8x32xf32> -> vector<8x32xf32>
    %10 = arith.mulf %9, %9 : vector<8x32xf32>
    %11 = tpu.concatenate %9, %10 in 1 : vector<8x32xf32>, vector<8x32xf32> -> vector<8x64xf32>
    %cst_10 = arith.constant dense<0.000000e+00> : vector<64xf32>
    %12 = vector.multi_reduction <add>, %11, %cst_10 [0] : vector<8x64xf32> to vector<64xf32>
    %13 = vector.shape_cast %12 : vector<64xf32> to vector<1x64xf32>
    %14 = vector.extract_strided_slice %13 {offsets = [0, 0], sizes = [1, 32], strides = [1, 1]} : vector<1x64xf32> to vector<1x32xf32>
    %cst_11 = arith.constant 1.250000e-01 : f32
    %15 = vector.broadcast %cst_11 : f32 to vector<1x32xf32>
    %16 = arith.mulf %14, %15 : vector<1x32xf32>
    %17 = vector.extract_strided_slice %13 {offsets = [0, 32], sizes = [1, 32], strides = [1, 1]} : vector<1x64xf32> to vector<1x32xf32>
    %cst_12 = arith.constant 1.250000e-01 : f32
    %18 = vector.broadcast %cst_12 : f32 to vector<1x32xf32>
    %19 = arith.mulf %17, %18 : vector<1x32xf32>
    %20 = arith.mulf %16, %16 : vector<1x32xf32>
    %21 = arith.subf %19, %20 : vector<1x32xf32>
    %22 = vector.broadcast %16 : vector<1x32xf32> to vector<8x32xf32>
    %23 = arith.subf %9, %22 : vector<8x32xf32>
    %cst_13 = arith.constant 9.99999974E-6 : f32
    %24 = vector.broadcast %cst_13 : f32 to vector<1x32xf32>
    %25 = arith.addf %21, %24 : vector<1x32xf32>
    %26 = math.rsqrt %25 : vector<1x32xf32>
    %27 = vector.broadcast %26 : vector<1x32xf32> to vector<8x32xf32>
    %28 = arith.mulf %23, %27 : vector<8x32xf32>
    %29 = vector.broadcast %4 : vector<1x32xf32> to vector<8x32xf32>
    %30 = arith.mulf %28, %29 : vector<8x32xf32>
    %31 = vector.broadcast %5 : vector<1x32xf32> to vector<8x32xf32>
    %32 = arith.addf %30, %31 : vector<8x32xf32>
    %cst_14 = arith.constant 0.000000e+00 : f32
    %33 = vector.broadcast %cst_14 : f32 to vector<8x32xf32>
    %34 = arith.cmpf oge, %32, %33 : vector<8x32xf32>
    %cst_15 = arith.constant 2.000000e-01 : f32
    %35 = vector.broadcast %cst_15 : f32 to vector<8x32xf32>
    %36 = arith.mulf %35, %32 : vector<8x32xf32>
    %37 = arith.select %34, %32, %36 : vector<8x32xi1>, vector<8x32xf32>
    %cst_16 = arith.constant dense<0.000000e+00> : vector<8x32xf32>
    %38 = tpu.matmul %37, %2, %cst_16 {dimension_numbers = #tpu.dot_dimension_numbers<[1], [0], [0], [1], [0, 0, 1, 1], [], []>} : vector<8x32xf32>, vector<32x32xf32>, vector<8x32xf32> -> vector<8x32xf32>
    %39 = arith.mulf %38, %38 : vector<8x32xf32>
    %40 = tpu.concatenate %38, %39 in 1 : vector<8x32xf32>, vector<8x32xf32> -> vector<8x64xf32>
    %cst_17 = arith.constant dense<0.000000e+00> : vector<64xf32>
    %41 = vector.multi_reduction <add>, %40, %cst_17 [0] : vector<8x64xf32> to vector<64xf32>
    %42 = vector.shape_cast %41 : vector<64xf32> to vector<1x64xf32>
    %43 = vector.extract_strided_slice %42 {offsets = [0, 0], sizes = [1, 32], strides = [1, 1]} : vector<1x64xf32> to vector<1x32xf32>
    %cst_18 = arith.constant 1.250000e-01 : f32
    %44 = vector.broadcast %cst_18 : f32 to vector<1x32xf32>
    %45 = arith.mulf %43, %44 : vector<1x32xf32>
    %46 = vector.extract_strided_slice %42 {offsets = [0, 32], sizes = [1, 32], strides = [1, 1]} : vector<1x64xf32> to vector<1x32xf32>
    %cst_19 = arith.constant 1.250000e-01 : f32
    %47 = vector.broadcast %cst_19 : f32 to vector<1x32xf32>
    %48 = arith.mulf %46, %47 : vector<1x32xf32>
    %49 = arith.mulf %45, %45 : vector<1x32xf32>
    %50 = arith.subf %48, %49 : vector<1x32xf32>
    %51 = vector.broadcast %45 : vector<1x32xf32> to vector<8x32xf32>
    %52 = arith.subf %38, %51 : vector<8x32xf32>
    %cst_20 = arith.constant 9.99999974E-6 : f32
    %53 = vector.broadcast %cst_20 : f32 to vector<1x32xf32>
    %54 = arith.addf %50, %53 : vector<1x32xf32>
    %55 = math.rsqrt %54 : vector<1x32xf32>
    %56 = vector.broadcast %55 : vector<1x32xf32> to vector<8x32xf32>
    %57 = arith.mulf %52, %56 : vector<8x32xf32>
    %58 = vector.broadcast %6 : vector<1x32xf32> to vector<8x32xf32>
    %59 = arith.mulf %57, %58 : vector<8x32xf32>
    %60 = vector.broadcast %7 : vector<1x32xf32> to vector<8x32xf32>
    %61 = arith.addf %59, %60 : vector<8x32xf32>
    %cst_21 = arith.constant 0.000000e+00 : f32
    %62 = vector.broadcast %cst_21 : f32 to vector<8x32xf32>
    %63 = arith.cmpf oge, %61, %62 : vector<8x32xf32>
    %cst_22 = arith.constant 2.000000e-01 : f32
    %64 = vector.broadcast %cst_22 : f32 to vector<8x32xf32>
    %65 = arith.mulf %64, %61 : vector<8x32xf32>
    %66 = arith.select %63, %61, %65 : vector<8x32xi1>, vector<8x32xf32>
    %67 = vector.broadcast %3 : vector<1x32xf32> to vector<8x32xf32>
    %68 = arith.mulf %66, %67 : vector<8x32xf32>
    %cst_23 = arith.constant dense<0.000000e+00> : vector<8xf32>
    %69 = vector.multi_reduction <add>, %68, %cst_23 [1] : vector<8x32xf32> to vector<8xf32>
    %70 = vector.shape_cast %69 : vector<8xf32> to vector<8x1xf32>
    %71 = vector.broadcast %8 : vector<1x1xf32> to vector<8x1xf32>
    %72 = arith.addf %70, %71 : vector<8x1xf32>
    %cst_24 = arith.constant 5.000000e-01 : f32
    %73 = vector.broadcast %cst_24 : f32 to vector<8x1xf32>
    %74 = arith.mulf %73, %72 : vector<8x1xf32>
    %75 = math.tanh %74 : vector<8x1xf32>
    %cst_25 = arith.constant 5.000000e-01 : f32
    %76 = vector.broadcast %cst_25 : f32 to vector<8x1xf32>
    %77 = arith.mulf %76, %75 : vector<8x1xf32>
    %cst_26 = arith.constant 5.000000e-01 : f32
    %78 = vector.broadcast %cst_26 : f32 to vector<8x1xf32>
    %79 = arith.addf %77, %78 : vector<8x1xf32>
    %c0_27 = arith.constant 0 : index
    %c0_28 = arith.constant 0 : index
    %80 = vector.load %arg2[%c0_27, %c0_28] : memref<8x1xf32, #tpu.memory_space<vmem>>, vector<8x1xf32>
    tpu.vector_store %arg2[%c0_27, %c0_28], %79 {strides = array<i32>} : memref<8x1xf32, #tpu.memory_space<vmem>>, vector<8x1xf32>,
    return
  }
}

</mosaic_0001>

<bundles_post_ra>
// kernel: tpu_custom_call.1
= control target key start
LH: loop header
LB: loop body
LE: loop exit
PB: predicated region body
PF: predicated region fallthrough
CT: control target
= control target key end

     0   :  { %vm27_vm0 = vcmask 1043456   ;;  %vm23_vm1 = vcmask 31744   ;;  %v338_v0 = vmov 0.0   ;;  %vm339_vm2 = vmmov 0   ;;  %s340_s13 = smov 32   ;;  %s342_s21 = smov 96   ;;  %s409_s1 = inlined_call_operand.vmem [shape: f32[56,32], index: 1, kind: input, shape index: {}]   ;;  %s410_s0 = inlined_call_operand.vmem [shape: f32[8,4], index: 0, kind: input, shape index: {}]   ;;  %s411_s2 = inlined_call_operand.vmem [shape: f32[8,1], index: 2, kind: output, shape index: {}]  }
   0x1   :  { %305 = vmatprep.subr.mxu0 %v338_v0  ;;  %v12_v1 = vld [vmem:[%s409_s1] sm:$0xf]  ;;  %307 = vmatprep.mubr.msk.f32.mxu0 %vm339_vm2, %v338_v0  ;;  %vm106_vm3 = vcmask 261120   ;;  %vm108_vm4 = vcmask 523264   ;;  %v126_v20 = vlaneseq  ;;  %v13_v21 = vld [vmem:[%s409_s1 + $0x8] sm:$0xff]  ;;  %v14_v22 = vld [vmem:[%s409_s1 + $0x10] sm:$0xff] }
   0x2   :  { %v11_v2 = vld [vmem:[%s410_s0] sm:$0xff]  ;;  %306 = vmatpush3.msk.msra.mxu0 %vm27_vm0, %v12_v1  ;;  %318 = vmatprep.mubr.msk.f32.mxu1 %vm339_vm2, %v338_v0  ;;  %v322_v23 = vpack.c.bf16 %v14_v22, %v13_v21  ;;  %v341_v24 = vmov 0.0|0.0   ;;  %v15_v26 = vld [vmem:[%s409_s1 + $0x18] sm:$0xff]  ;;  %v291_v33 = vld [vmem:[%s409_s1 + $0x30] ss:$0 sm:$0xff]  ;;  %vm283_vm7 = vcmask 7168  }
   0x3   :  { %308 = vmatmul.mubr.msk.f32.vlgmr.msra.gmra.mrb[0].mxu0 %vm23_vm1, %v11_v2  ;;  %321 = vmatprep.subr.bf16.mxu1 %v341_v24  ;;  %v127_v25 = vshrl.u32 %v126_v20, 7  ;;  %v16_v27 = vld [vmem:[%s409_s1 + $0x20] sm:$0xff]  ;;  %v292_v36 = vld [vmem:[%s409_s1 + $0x31] ss:$0 sm:$0xff]  ;;  %v294_v61 = vld [vmem:[%s409_s1 + $0x32] ss:$0 sm:$0xff] }
   0x4   :  { %323 = vmatpush3.bf16.msra.mxu1 %v322_v23  ;;  %v325_v28 = vpack.c.bf16 %v16_v27, %v15_v26  ;;  %v295_v0 = vld [vmem:[%s409_s1 + $0x33] ss:$0 sm:$0xff] }
   0x5   :  { %324 = vmatprep.subr.bf16.mxu1 %v341_v24  ;;  %v128_v29 = vsub.s32 0, %v127_v25 }
   0x8   :  { %326 = vmatpush3.bf16.msra.mxu1 %v325_v28 }
  0xd6   :  { %v97_v3 = vpop.f32.mrb[0].mxu0 }
  0xd7   :  { %v309_v4 = vpop.f32.mrb[1].mxu0  ;;  %v101_v5 = vmul.f32 %v97_v3, %v97_v3 }
  0xd9   :  { %103 = vrot.lane.b32.xlu0 %v101_v5, %s340_s13 }
 0x14b   :  { %v104_v6 = vpop.permute.xlu0 %103 }
 0x14c   :  { %v107_v7 = vsel %vm106_vm3, %v97_v3, %v104_v6 }
 0x14d   :  { %v109_v8 = vsel %vm108_vm4, %v107_v7, 0.0 }
 0x14e   :  { %v110_v9 = vrot.slane %v109_v8, 4 }
 0x150   :  { %v111_v10 = vadd.f32 %v110_v9, %v109_v8  ;;  %v297_v8 = vld [vmem:[%s409_s1 + $0x34] ss:$0 sm:$0xff] }
 0x152   :  { %v112_v11 = vrot.slane %v111_v10, 2 }
 0x154   :  { %v113_v12 = vadd.f32 %v112_v11, %v111_v10 }
 0x156   :  { %v114_v13 = vrot.slane %v113_v12, 1 }
 0x158   :  { %v115_v14 = vadd.f32 %v114_v13, %v113_v12 }
 0x15a   :  { %v116_v15 = vmul.f32 0.125, %v115_v14 }
 0x15c   :  { %v117_v16 = vmul.f32 %v116_v15, %v116_v15  ;;  %v123_v32 = vsub.f32 %v97_v3, %v116_v15  ;;  %v296_v3 = vld [vmem:[%s409_s1 + $0x28] ss:$0 sm:$0xff] }
 0x15e   :  { %119 = vrot.lane.b32.xlu0 %v117_v16, %s340_s13 }
 0x1d0   :  { %v120_v17 = vpop.permute.xlu0 %119 }
 0x1d1   :  { %v122_v18 = vsub.f32 %v116_v15, %v120_v17 }
 0x1d3   :  { %v124_v19 = vadd.f32 1e-05, %v122_v18 }
 0x1d5   :  { %332 = vrsqrt.f32 %v124_v19 }
 0x1df   :  { %v333_v30 = vpop.eup %332 }
 0x1e0   :  { %v129_v31 = vrot.slane %v333_v30, %v128_v29 }
 0x1e2   :  { %131 = vrot.lane.b32.xlu1 %v129_v31, %s342_s21 }
 0x254   :  { %v132_v34 = vpop.permute.xlu1 %131 }
 0x255   :  { %v134_v35 = vmul.f32 %v132_v34, %v123_v32 }
 0x257   :  { %v139_v37 = vmul.f32 %v291_v33, %v134_v35 }
 0x259   :  { %v144_v38 = vadd.f32 %v292_v36, %v139_v37 }
 0x25b   :  { %vm145_vm5 = vcmp.ge.f32.partialorder %v144_v38, 0.0  ;;  %v146_v39 = vmul.f32 0.2, %v144_v38 }
 0x25d   :  { %v147_v40 = vsel %vm145_vm5, %v144_v38, %v146_v39 }
 0x25e   :  { %319 = vmatmul.mubr.msk.f32.vlgmr.msra.gmra.mrb[0].mxu1 %vm106_vm3, %v147_v40 }
 0x331   :  { %v217_v41 = vpop.f32.mrb[0].mxu1 }
 0x332   :  { %v221_v42 = vmul.f32 %v217_v41, %v217_v41  ;;  %v320_v43 = vpop.f32.mrb[1].mxu1 }
 0x334   :  { %223 = vrot.lane.b32.xlu1 %v221_v42, %s340_s13 }
 0x3a6   :  { %v224_v44 = vpop.permute.xlu1 %223 }
 0x3a7   :  { %v226_v45 = vsel %vm106_vm3, %v217_v41, %v224_v44 }
 0x3a8   :  { %v227_v46 = vsel %vm108_vm4, %v226_v45, 0.0 }
 0x3a9   :  { %v228_v47 = vrot.slane %v227_v46, 4 }
 0x3ab   :  { %v229_v48 = vadd.f32 %v228_v47, %v227_v46 }
 0x3ad   :  { %v230_v49 = vrot.slane %v229_v48, 2 }
 0x3af   :  { %v231_v50 = vadd.f32 %v230_v49, %v229_v48 }
 0x3b1   :  { %v232_v51 = vrot.slane %v231_v50, 1 }
 0x3b3   :  { %v233_v52 = vadd.f32 %v232_v51, %v231_v50 }
 0x3b5   :  { %v234_v53 = vmul.f32 0.125, %v233_v52 }
 0x3b7   :  { %v235_v54 = vmul.f32 %v234_v53, %v234_v53  ;;  %v241_v60 = vsub.f32 %v217_v41, %v234_v53 }
 0x3b9   :  { %237 = vrot.lane.b32.xlu0 %v235_v54, %s340_s13 }
 0x42b   :  { %v238_v55 = vpop.permute.xlu0 %237 }
 0x42c   :  { %v240_v56 = vsub.f32 %v234_v53, %v238_v55 }
 0x42e   :  { %v242_v57 = vadd.f32 1e-05, %v240_v56 }
 0x430   :  { %334 = vrsqrt.f32 %v242_v57 }
 0x43a   :  { %v335_v58 = vpop.eup %334 }
 0x43b   :  { %v247_v59 = vrot.slane %v335_v58, %v128_v29 }
 0x43d   :  { %249 = vrot.lane.b32.xlu1 %v247_v59, %s342_s21 }
 0x4af   :  { %v250_v62 = vpop.permute.xlu1 %249 }
 0x4b0   :  { %v252_v63 = vmul.f32 %v250_v62, %v241_v60 }
 0x4b2   :  { %v257_v1 = vmul.f32 %v294_v61, %v252_v63 }
 0x4b4   :  { %v262_v2 = vadd.f32 %v295_v0, %v257_v1 }
 0x4b6   :  { %vm263_vm6 = vcmp.ge.f32.partialorder %v262_v2, 0.0  ;;  %v264_v4 = vmul.f32 0.2, %v262_v2 }
 0x4b8   :  { %v265_v5 = vsel %vm263_vm6, %v262_v2, %v264_v4 }
 0x4b9   :  { %v270_v6 = vmul.f32 %v296_v3, %v265_v5 }
 0x4bb   :  { %v271_v7 = vsel %vm106_vm3, %v270_v6, 0.0 }
 0x4bc   :  { %272 = vadd.xlane.f32.xlu0 %v271_v7 }
 0x549   :  { %v273_v9 = vpop.xlane.xlu0 %272 }
 0x54a   :  { %v278_v10 = vadd.f32 %v297_v8, %v273_v9 }
 0x54c   :  { %v279_v11 = vmul.f32 0.5, %v278_v10 }
 0x54e   :  { %336 = vtanh.f32 %v279_v11 }
 0x558   :  { %v337_v12 = vpop.eup %336 }
 0x559   :  { %v281_v13 = vmul.f32 0.5, %v337_v12 }
 0x55b   :  { %v282_v14 = vadd.f32 0.5, %v281_v13 }
 0x55d   :  { %284 = vst.msk [vmem:[%s411_s2] sm:$0xff] %vm283_vm7, %v282_v14 }

</bundles_post_ra>
